<compile_context>
chip_gen: v6e
topology: v6e:2x2x1
jax: 0.10.0
libtpu: 0.0.40
codegen_flags: <defaults>
</compile_context>

<pallas_src>
import functools

import jax
import jax.numpy as jnp
from jax.experimental import pallas as pl
from jax.experimental.pallas import tpu as pltpu


_NEG_BIG = -1e30  # softmax mask for padded label lanes (NaN-safe "-inf")


def _round_up(x, m):
    return ((x + m - 1) // m) * m


def _cdiv(a, b):
    return (a + b - 1) // b


def _vmem_budget_bytes():
    """Generation-aware VMEM budget (leaves headroom for compiler scratch)."""
    try:
        cap = pltpu.get_tpu_info().vmem_capacity_bytes
    except Exception:
        cap = 64 * 1024 * 1024  # conservative fallback: v7x per-TC VMEM
    return int(min(cap * 0.72, 96 * 1024 * 1024))


def _cls_head_kernel(x_ref, w_ref, b_ref, o_ref, *, n_labels, compute_dtype):
    # x_ref: [TB, E] (input dtype)        w_ref: [E, L_pad] (compute dtype)
    # b_ref: [1, L_pad] f32 (-1e30 pad)   o_ref: [TB, L] f32
    x = x_ref[...].astype(compute_dtype)           # free VPU cast, mem-bound kernel
    logits = jnp.dot(x, w_ref[...],
                     preferred_element_type=jnp.float32) + b_ref[...]
    # Numerically-stable softmax over the lane-dense (padded) label axis;
    # padded lanes carry -1e30 bias -> exp == 0, denom untouched.
    m = jnp.max(logits, axis=-1, keepdims=True)
    e = jnp.exp(logits - m)
    denom = jnp.sum(e, axis=-1, keepdims=True)
    probs = e / denom                              # exact f32 divide (hidden by DMA)
    o_ref[...] = probs[:, :n_labels].astype(o_ref.dtype)


def pack_head_params(w, b, *, compute_dtype=jnp.bfloat16):
    """One-time packing of nn.Linear params: [L, E] -> [E, L_pad] + masked bias.

    Hoisted out of the per-call path so W is not re-read/re-written every call.
    """
    L, E = w.shape
    assert b.shape == (L,)
    l_pad = _round_up(L, 128)
    w_packed = jnp.zeros((E, l_pad), compute_dtype).at[:, :L].set(
        w.T.astype(compute_dtype))
    b_packed = jnp.full((1, l_pad), _NEG_BIG, jnp.float32).at[0, :L].set(
        b.astype(jnp.float32))
    return w_packed, b_packed


def _pick_batch_tile(B, E, l_pad, n_labels, x_bytes, w_bytes, budget_bytes):
    """Largest power-of-two batch tile whose working set fits the VMEM budget."""
    e_lanes = _round_up(E, 128)            # VMEM lane padding of the x tile
    o_lanes = _round_up(n_labels, 128)     # VMEM lane padding of the output tile
    e_rows = _round_up(E, 16)              # sublane padding of the packed weight
    # Resident (constant index_map) buffers: weight + bias, double-buffered allocs.
    resident = 2 * e_rows * l_pad * w_bytes + 2 * 8 * l_pad * 4
    if resident > budget_bytes:
        # TODO(synk): add an L-tiled (two-pass / online softmax) path for very
        # large label counts whose resident weight does not fit in VMEM.
        raise ValueError(
            f"resident weight needs {resident} B > VMEM budget {budget_bytes} B; "
            "label-axis tiling not implemented")
    per_row = 2 * e_lanes * x_bytes + 2 * o_lanes * 4   # double-buffered x + out
    tb = 1024
    while tb > 8 and resident + tb * per_row > budget_bytes:
        tb //= 2
    if resident + tb * per_row > budget_bytes:
        tb = 8   # smallest legal tile; resident already checked above
    return tb


def classification_head_packed(x, w_packed, b_packed, n_labels, *,
                               compute_dtype=jnp.bfloat16):
    """Fused Linear + Softmax head on pre-packed parameters.

    x:        [B, E] float   -- already-encoded sentence embeddings (streamed as-is)
    w_packed: [E, L_pad]     -- from pack_head_params
    b_packed: [1, L_pad] f32 -- from pack_head_params
    returns probs [B, n_labels] float32 (softmax over labels == PyTorch dim=1).
    """
    B, E = x.shape
    E2, l_pad = w_packed.shape
    assert E == E2 and b_packed.shape == (1, l_pad) and n_labels <= l_pad

    x_bytes = jnp.dtype(x.dtype).itemsize
    w_bytes = jnp.dtype(compute_dtype).itemsize
    budget = _vmem_budget_bytes()

    tb = _pick_batch_tile(B, E, l_pad, n_labels, x_bytes, w_bytes, budget)
    # Keep >= ~4 grid steps at large B (v7x megacore x pipeline depth 2);
    # only binds when B is large enough to matter.
    tb = min(tb, max(8, _round_up(_cdiv(B, 4), 8)))
    tb = min(tb, _round_up(B, 8))          # do not exceed the batch
    n_steps = _cdiv(B, tb)                 # ragged last tile handled by Pallas

    kernel = functools.partial(_cls_head_kernel,
                               n_labels=n_labels, compute_dtype=compute_dtype)

    cost = pl.CostEstimate(
        flops=2 * B * E * l_pad,
        transcendentals=B * l_pad,
        bytes_accessed=(B * E * x_bytes          # read x (no copy, no padding)
                        + E * l_pad * w_bytes    # read packed W once
                        + l_pad * 4              # read bias
                        + B * n_labels * 4),     # write exact-shaped probs
    )

    return pl.pallas_call(
        kernel,
        out_shape=jax.ShapeDtypeStruct((B, n_labels), jnp.float32),
        grid_spec=pltpu.PrefetchScalarGridSpec(
            num_scalar_prefetch=0,
            grid=(n_steps,),
            in_specs=[
                # x: batch-tiled, full (unpadded) E dim -> legal block (== array dim)
                pl.BlockSpec((tb, E), lambda i: (i, 0)),
                # W / bias: constant index_map -> resident in VMEM across steps
                pl.BlockSpec((E, l_pad), lambda i: (0, 0)),
                pl.BlockSpec((1, l_pad), lambda i: (0, 0)),
            ],
            # exact (tb, L) output block -> no padded write, no post-kernel slice
            out_specs=pl.BlockSpec((tb, n_labels), lambda i: (i, 0)),
        ),
        compiler_params=pltpu.CompilerParams(
            dimension_semantics=("parallel",),    # megacore sharding of batch tiles
            vmem_limit_bytes=budget,
        ),
        cost_estimate=cost,
    )(x, w_packed, b_packed)


def classification_head(x, w, b, *, compute_dtype=jnp.bfloat16):
    """Convenience wrapper taking PyTorch-layout params (packs them per call)."""
    w_packed, b_packed = pack_head_params(w, b, compute_dtype=compute_dtype)
    return classification_head_packed(x, w_packed, b_packed, w.shape[0],
                                      compute_dtype=compute_dtype)


def reference(x, w, b):
    logits = x @ w.T + b
    return jax.nn.softmax(logits, axis=-1)


if __name__ == "__main__":
    # Small shapes consistent with the module: size_embedding=32, n_labels=4, batch=8.
    B, E, L = 8, 32, 4

    key = jax.random.PRNGKey(0)
    kx, kw, kb = jax.random.split(key, 3)

    # TODO(synk): cff_model.encode is an external sentence-transformer text
    # encoder with no Pallas equivalent; pre-encoded embeddings are synthesized.
    x = jax.random.normal(kx, (B, E), dtype=jnp.float32)

    # Deterministic nn.Linear-style init: U(-1/sqrt(E), 1/sqrt(E)).
    bound = 1.0 / (E ** 0.5)
    w = jax.random.uniform(kw, (L, E), minval=-bound, maxval=bound,
                           dtype=jnp.float32)   # PyTorch layout [L, E]
    b = jax.random.uniform(kb, (L,), minval=-bound, maxval=bound,
                           dtype=jnp.float32)

    # Pack the head parameters once (hoisted out of the per-call path) and run.
    w_packed, b_packed = pack_head_params(w, b)
    out = classification_head_packed(x, w_packed, b_packed, L)
    out = jax.block_until_ready(out)

    ref = reference(x, w, b)
    assert out.shape == (B, L)
    # bf16 weight/MXU precision -> relaxed elementwise tolerance vs f32 reference.
    assert jnp.allclose(out, ref, atol=2e-2, rtol=2e-2), \
        float(jnp.max(jnp.abs(out - ref)))
    # Exact f32 divide -> rows are normalized to float32 precision.
    assert jnp.allclose(jnp.sum(out, axis=-1), 1.0, atol=1e-5)

    print("KERNEL_OK")
</pallas_src>

<mosaic_0001>
module attributes {stable_mosaic.version = 11 : i64} {
  func.func @_cls_head_kernel(%arg0: i32, %arg1: memref<8x32xf32, #tpu.memory_space<vmem>>, %arg2: memref<32x128xbf16, #tpu.memory_space<vmem>>, %arg3: memref<1x128xf32, #tpu.memory_space<vmem>>, %arg4: memref<8x4xf32, #tpu.memory_space<vmem>>) attributes {dimension_semantics = [#tpu.dimension_semantics<parallel>], iteration_bounds = array<i64: 1>, scalar_prefetch = 0 : i64, scratch_operands = 0 : i64, tpu.core_type = #tpu.core_type<tc>, window_params = [{transform_indices = @transform_0, window_bounds = array<i64: 8, 32>}, {pipeline_mode = #tpu.pipeline_mode<synchronous>, transform_indices = @transform_1, window_bounds = array<i64: 32, 128>}, {pipeline_mode = #tpu.pipeline_mode<synchronous>, transform_indices = @transform_2, window_bounds = array<i64: 1, 128>}, {transform_indices = @transform_3, window_bounds = array<i64: 8, 4>}]} {
    %c0 = arith.constant 0 : index
    %c0_0 = arith.constant 0 : index
    %0 = vector.load %arg1[%c0, %c0_0] : memref<8x32xf32, #tpu.memory_space<vmem>>, vector<8x32xf32>
    %1 = arith.truncf %0 : vector<8x32xf32> to vector<8x32xbf16>
    %c0_1 = arith.constant 0 : index
    %c0_2 = arith.constant 0 : index
    %2 = vector.load %arg2[%c0_1, %c0_2] : memref<32x128xbf16, #tpu.memory_space<vmem>>, vector<32x128xbf16>
    %cst = arith.constant dense<0.000000e+00> : vector<8x128xf32>
    %3 = tpu.matmul %1, %2, %cst {dimension_numbers = #tpu.dot_dimension_numbers<[1], [0], [0], [1], [0, 0, 1, 1], [], []>} : vector<8x32xbf16>, vector<32x128xbf16>, vector<8x128xf32> -> vector<8x128xf32>
    %c0_3 = arith.constant 0 : index
    %c0_4 = arith.constant 0 : index
    %4 = vector.load %arg3[%c0_3, %c0_4] : memref<1x128xf32, #tpu.memory_space<vmem>>, vector<1x128xf32>
    %5 = vector.broadcast %4 : vector<1x128xf32> to vector<8x128xf32>
    %6 = arith.addf %3, %5 : vector<8x128xf32>
    %cst_5 = arith.constant dense<0xFF800000> : vector<8xf32>
    %7 = vector.multi_reduction <maximumf>, %6, %cst_5 [1] : vector<8x128xf32> to vector<8xf32>
    %8 = vector.shape_cast %7 : vector<8xf32> to vector<8x1xf32>
    %9 = vector.broadcast %8 : vector<8x1xf32> to vector<8x128xf32>
    %10 = arith.subf %6, %9 : vector<8x128xf32>
    %11 = math.exp %10 : vector<8x128xf32>
    %cst_6 = arith.constant dense<0.000000e+00> : vector<8xf32>
    %12 = vector.multi_reduction <add>, %11, %cst_6 [1] : vector<8x128xf32> to vector<8xf32>
    %13 = vector.shape_cast %12 : vector<8xf32> to vector<8x1xf32>
    %14 = vector.broadcast %13 : vector<8x1xf32> to vector<8x128xf32>
    %15 = arith.divf %11, %14 : vector<8x128xf32>
    %16 = vector.extract_strided_slice %15 {offsets = [0, 0], sizes = [8, 4], strides = [1, 1]} : vector<8x128xf32> to vector<8x4xf32>
    %c0_7 = arith.constant 0 : index
    %c0_8 = arith.constant 0 : index
    %17 = vector.load %arg4[%c0_7, %c0_8] : memref<8x4xf32, #tpu.memory_space<vmem>>, vector<8x4xf32>
    tpu.vector_store %arg4[%c0_7, %c0_8], %16 {strides = array<i32>} : memref<8x4xf32, #tpu.memory_space<vmem>>, vector<8x4xf32>,
    return
  }
  func.func @transform_0(%arg0: i32) -> (i32, i32) {
    %c0_i32 = arith.constant 0 : i32
    %c0_i32_0 = arith.constant 0 : i32
    return %arg0, %c0_i32 : i32, i32
  }
  func.func @transform_1(%arg0: i32) -> (i32, i32) {
    %c0_i32 = arith.constant 0 : i32
    %c0_i32_0 = arith.constant 0 : i32
    %c0_i32_1 = arith.constant 0 : i32
    return %c0_i32, %c0_i32_0 : i32, i32
  }
  func.func @transform_2(%arg0: i32) -> (i32, i32) {
    %c0_i32 = arith.constant 0 : i32
    %c0_i32_0 = arith.constant 0 : i32
    %c0_i32_1 = arith.constant 0 : i32
    return %c0_i32, %c0_i32_0 : i32, i32
  }
  func.func @transform_3(%arg0: i32) -> (i32, i32) {
    %c0_i32 = arith.constant 0 : i32
    %c0_i32_0 = arith.constant 0 : i32
    return %arg0, %c0_i32 : i32, i32
  }
}

</mosaic_0001>

<bundles_post_ra>
// kernel: tpu_custom_call.1
= control target key start
LH: loop header
LB: loop body
LE: loop exit
PB: predicated region body
PF: predicated region fallthrough
CT: control target
= control target key end

     0   :  { %8 = vsyncpa [#allocation3], 0  ;;  %s236_s0 = inlined_call_operand.hbm [shape: f32[8,32], index: 0, kind: input, shape index: {}]   ;;  %s237_s1 = inlined_call_operand.hbm [shape: bf16[32,128], index: 1, kind: input, shape index: {}]   ;;  %s238_s2 = inlined_call_operand.vmem [shape: f32[1,128], index: 2, kind: input, shape index: {}]   ;;  %s239_s3 = inlined_call_operand.vmem [shape: f32[8,4], index: 3, kind: output, shape index: {}]  }
   0x1   :  { %9 = vsyncpa [#allocation5], 0  ;;  %s198_s12 = smov [#allocation2]   ;;  %s199_s14 = smov [#allocation4]  }
   0x2   :  { %s16_s13 = sshll.u32 %s198_s12, 4  ;;  %s25_s15 = sshll.u32 %s199_s14, 4  ;;  %s17_s13 = int_to_ptr.vmem [resolvable:$true] %s16_s13  ;;  %s26_s15 = int_to_ptr.vmem [resolvable:$true] %s25_s15 }
   0x3   :  { %s162_s16 = scalar_lea.vmem %s17_s13, 128  ;;  %p167_p1 = scmp.lt.s32.totalorder %s17_s13, %s17_s13 }
   0x4   :  { %p163_p0 = scmp.ne.s32.totalorder %s17_s13, %s162_s16  ;;  %p168_p2 = scmp.lt.s32.totalorder %s162_s16, %s162_s16 }
   0x6   :  { %p169_p3 = por %p168_p2, %p167_p1 }
   0x8   :  { %p170_p4 = pnand %p169_p3, %p163_p0 }
   0xa   :  { %173 = shalt.err (!%p170_p4)
}
   0xb   :  { %19 = dma.hbm_to_vmem [thread:$0]  %s236_s0, 128, %s17_s13, [#allocation3]  }
   0xc   :  { %s182_s19 = scalar_lea.vmem %s26_s15, 256  ;;  %p187_p6 = scmp.lt.s32.totalorder %s26_s15, %s26_s15 }
   0xd   :  { %p183_p5 = scmp.ne.s32.totalorder %s26_s15, %s182_s19  ;;  %p188_p7 = scmp.lt.s32.totalorder %s182_s19, %s182_s19 }
   0xf   :  { %p189_p8 = por %p188_p7, %p187_p6 }
  0x11   :  { %p190_p9 = pnand %p189_p8, %p183_p5 }
  0x13   :  { %193 = shalt.err (!%p190_p9)
}
  0x14   :  { %s200_s20 = smov 64   ;;  %s201_s21 = smov 4  }
  0x15   :  { %31 = dma.hbm_to_vmem [thread:$0]  %s237_s1, 256, %s26_s15, [#allocation5], %s200_s20, %s200_s20, %s201_s21  }
  0x16   :  { %194 = dma.done.wait [#allocation3], 128  }
  0x17   :  { %195 = vsyncadd [#allocation3], 4294967168 }
  0x18   :  { %196 = dma.done.wait [#allocation5], 256  }
  0x19   :  { %197 = vsyncadd [#allocation5], 4294967040  ;;  %v202_v0 = vmov 0.0   ;;  %vm203_vm0 = vmmov 0   ;;  %v148_v1 = vld [vmem:[#allocation4 + $0x8] sm:$0xff]   ;;  %v149_v2 = vld [vmem:[#allocation4] sm:$0xff]  }
  0x1a   :  { %134 = vmatprep.subr.bf16.mxu0 %v202_v0  ;;  %138 = vmatprep.mubr.msk.bf16.mxu0 %vm203_vm0, %v202_v0  ;;  %v41_v3 = vld [vmem:[#allocation2] sm:$0xff]  ;;  %vm66_vm1 = vcmask 261120   ;;  %vm119_vm2 = vcmask 31744  }
  0x1b   :  { %135 = vmatpush3.bf16.msra.mxu0 %v148_v1  ;;  %v42_v4 = vpack.c.bf16 %v41_v3, %v41_v3  ;;  %v127_v5 = vld [vmem:[%s238_s2] ss:$0 sm:$0xff] }
  0x1c   :  { %136 = vmatprep.subr.bf16.mxu0 %v202_v0 }
  0x1f   :  { %137 = vmatpush3.bf16.msra.mxu0 %v149_v2 }
  0x22   :  { %139 = vmatmul.mubr.msk.bf16.vlgmr.msra.gmra.mxu0 %vm66_vm1, %v42_v4 }
  0xe2   :  { %v104_v6 = vpop.f32.mrf.mxu0 }
  0xe3   :  { %v105_v7 = vadd.f32 %v127_v5, %v104_v6 }
  0xe4   :  { %v140_v8 = vpop.f32.mrf.mxu0 }
  0xe5   :  { %110 = vmax.xlane.f32.xlu0 %v105_v7 }
  0xe6   :  { %v107_v9 = vpop.f32.mrf.mxu0 }
  0xe8   :  { %v141_v10 = vpop.f32.mrf.mxu0 }
 0x16e   :  { %v111_v11 = vpop.xlane.xlu0 %110 }
 0x16f   :  { %v112_v12 = vsub.f32 %v105_v7, %v111_v11 }
 0x171   :  { %v113_v13 = vmul.f32 1.442695, %v112_v12 }
 0x173   :  { %150 = vpow2.f32 %v113_v13 }
 0x180   :  { %v151_v14 = vpop.eup %150 }
 0x181   :  { %115 = vadd.xlane.f32.xlu0 %v151_v14 }
 0x20a   :  { %v116_v15 = vpop.xlane.xlu0 %115 }
 0x20b   :  { %152 = vrcp.f32 %v116_v15 }
 0x218   :  { %v153_v16 = vpop.eup %152 }
 0x219   :  { %v118_v17 = vmul.f32 %v153_v16, %v151_v14 }
 0x21b   :  { %120 = vst.msk [vmem:[%s239_s3] sm:$0xff] %vm119_vm2, %v118_v17 }
 0x21c   :  { %125 = vsyncpa [#allocation3], 1 }
 0x21d   :  { %126 = vsyncpa [#allocation5], 1 }

</bundles_post_ra>
